<compile_context>
chip_gen: v5e
topology: v5e:2x2
jax: 0.10.0
libtpu: 0.0.40
codegen_flags: <defaults>
</compile_context>

<pallas_src>
import functools

import jax
import jax.numpy as jnp
from jax.experimental import pallas as pl
from jax.experimental.pallas import tpu as pltpu


def _round_up(x: int, m: int) -> int:
    return ((x + m - 1) // m) * m


def _bert_embedding_kernel(seed_ref, rel_ids_ref, pos_ids_ref,
                           rel_tab_ref, pos_tab_ref, out_ref,
                           *, drop_p: float, training: bool):
    k = pl.program_id(1)
    nk = pl.num_programs(1)
    tm, _ = out_ref.shape
    tv = rel_tab_ref.shape[0]
    L = pos_tab_ref.shape[0]

    # ---- init: output block is resident across the vocab (reduction) axis ----
    @pl.when(k == 0)
    def _():
        out_ref[...] = jnp.zeros_like(out_ref)

    # ---- relation embedding: K-tiled one-hot gather as a 2-D MXU matmul ----
    rel_ids = rel_ids_ref[...]                                       # (tm, 1) int32
    col = jax.lax.broadcasted_iota(jnp.int32, (tm, tv), 1) + k * tv  # (tm, tv)
    onehot = (rel_ids == col).astype(rel_tab_ref.dtype)              # 0/1, exact
    acc = out_ref[...] + jnp.dot(onehot, rel_tab_ref[...],
                                 preferred_element_type=jnp.float32)

    # ---- partial result: just accumulate ----
    @pl.when(k < nk - 1)
    def _():
        out_ref[...] = acc.astype(out_ref.dtype)

    # ---- finalize on the last vocab tile: + positional embedding, dropout ----
    @pl.when(k == nk - 1)
    def _():
        pos_ids = pos_ids_ref[...]                                   # (tm, 1) int32
        pcol = jax.lax.broadcasted_iota(jnp.int32, (tm, L), 1)       # (tm, L)
        ponehot = (pos_ids == pcol).astype(pos_tab_ref.dtype)
        emb = acc + jnp.dot(ponehot, pos_tab_ref[...],
                            preferred_element_type=jnp.float32)

        if training and drop_p > 0.0:
            # Per-token-tile seed so different tiles get independent masks.
            pltpu.prng_seed(seed_ref[0] + pl.program_id(0))
            bits = pltpu.bitcast(pltpu.prng_random_bits(emb.shape), jnp.uint32)
            thresh = jnp.uint32(min(int(round(drop_p * float(1 << 32))),
                                    (1 << 32) - 1))
            keep = bits >= thresh                                    # P(drop) = drop_p
            emb = jnp.where(keep, emb * (1.0 / (1.0 - drop_p)), jnp.float32(0.0))
        # eval mode: nn.Dropout is the identity.

        out_ref[...] = emb.astype(out_ref.dtype)


def bert_embedding(rel_seq, pos_seq, rel_table, pos_table,
                   *, drop_p: float = 0.1, training: bool = False, seed: int = 0,
                   tm: int = 256, tv: int = 512):
    B, S = rel_seq.shape
    V, D = rel_table.shape
    L, Dp = pos_table.shape
    assert D == Dp

    T = B * S
    tm = min(tm, _round_up(T, 8))          # token-tile rows (sublane-aligned)
    tv = min(tv, _round_up(V, 8))          # vocab-tile rows (sublane-aligned)
    T_pad = _round_up(T, tm)
    V_pad = _round_up(V, tv)

    rel_flat = jnp.reshape(rel_seq.astype(jnp.int32), (T, 1))
    pos_flat = jnp.reshape(pos_seq.astype(jnp.int32), (T, 1))
    if T_pad != T:
        rel_flat = jnp.pad(rel_flat, ((0, T_pad - T), (0, 0)))
        pos_flat = jnp.pad(pos_flat, ((0, T_pad - T), (0, 0)))
    rel_tab = rel_table
    if V_pad != V:
        rel_tab = jnp.pad(rel_table, ((0, V_pad - V), (0, 0)))

    nT = T_pad // tm
    nK = V_pad // tv

    kernel = functools.partial(_bert_embedding_kernel,
                               drop_p=float(drop_p), training=bool(training))
    seed_arr = jnp.asarray([seed], dtype=jnp.int32)

    grid_spec = pltpu.PrefetchScalarGridSpec(
        num_scalar_prefetch=1,             # seed -> SMEM
        grid=(nT, nK),                     # reduction (vocab) axis last
        in_specs=[
            pl.BlockSpec((tm, 1), lambda i, k, *_: (i, 0)),   # rel ids tile
            pl.BlockSpec((tm, 1), lambda i, k, *_: (i, 0)),   # pos ids tile
            pl.BlockSpec((tv, D), lambda i, k, *_: (k, 0)),   # rel table K-slab
            pl.BlockSpec((L, D), lambda i, k, *_: (0, 0)),    # pos table (small, resident)
        ],
        out_specs=pl.BlockSpec((tm, D), lambda i, k, *_: (i, 0)),
    )

    out = pl.pallas_call(
        kernel,
        out_shape=jax.ShapeDtypeStruct((T_pad, D), jnp.float32),
        grid_spec=grid_spec,
        compiler_params=pltpu.CompilerParams(
            dimension_semantics=("parallel", "arbitrary"),
            vmem_limit_bytes=64 << 20),
    )(seed_arr, rel_flat, pos_flat, rel_tab, pos_table)

    return out[:T].reshape(B, S, D)


if __name__ == "__main__":
    # Small, deterministic config consistent with the module's __init__.
    vocab_size, embed_dim, max_len = 16, 32, 16
    batch, seq_len = 2, 8

    key = jax.random.PRNGKey(0)
    k_rel, k_pos, k_ids = jax.random.split(key, 3)

    # Deterministic "trained" parameters (nn.Embedding weights).
    rel_table = jax.random.normal(k_rel, (vocab_size, embed_dim), jnp.float32) * 0.02
    pos_table = jax.random.normal(k_pos, (max_len, embed_dim), jnp.float32) * 0.02

    # Inputs: relation-id sequence and position-id sequence.
    rel_seq = jax.random.randint(k_ids, (batch, seq_len), 0, vocab_size, dtype=jnp.int32)
    pos_seq = jnp.broadcast_to(jnp.arange(seq_len, dtype=jnp.int32)[None, :],
                               (batch, seq_len))

    # Eval mode (dropout = identity), matching module.eval() semantics.
    out = bert_embedding(rel_seq, pos_seq, rel_table, pos_table,
                         drop_p=0.1, training=False)
    out = jax.block_until_ready(out)

    # Pure-JAX reference for correctness.
    ref = jnp.take(rel_table, rel_seq, axis=0) + jnp.take(pos_table, pos_seq, axis=0)
    assert out.shape == (batch, seq_len, embed_dim)
    assert jnp.allclose(out, ref, atol=1e-5, rtol=1e-5), "mismatch vs reference"

    print("KERNEL_OK")
</pallas_src>

<mosaic_0001>
module attributes {stable_mosaic.version = 11 : i64} {
  func.func @_bert_embedding_kernel(%arg0: i32, %arg1: i32, %arg2: memref<1xi32, #tpu.memory_space<smem>>, %arg3: memref<16x1xi32, #tpu.memory_space<vmem>>, %arg4: memref<16x1xi32, #tpu.memory_space<vmem>>, %arg5: memref<16x32xf32, #tpu.memory_space<vmem>>, %arg6: memref<16x32xf32, #tpu.memory_space<vmem>>, %arg7: memref<16x32xf32, #tpu.memory_space<vmem>>) attributes {dimension_semantics = [#tpu.dimension_semantics<parallel>, #tpu.dimension_semantics<arbitrary>], iteration_bounds = array<i64: 1, 1>, scalar_prefetch = 1 : i64, scratch_operands = 0 : i64, tpu.core_type = #tpu.core_type<tc>, window_params = [{transform_indices = @transform_0, window_bounds = array<i64: 16, 1>}, {transform_indices = @transform_1, window_bounds = array<i64: 16, 1>}, {transform_indices = @transform_2, window_bounds = array<i64: 16, 32>}, {pipeline_mode = #tpu.pipeline_mode<synchronous>, transform_indices = @transform_3, window_bounds = array<i64: 16, 32>}, {transform_indices = @transform_4, window_bounds = array<i64: 16, 32>}]} {
    %c0_i32 = arith.constant 0 : i32
    %0 = arith.cmpi eq, %arg1, %c0_i32 : i32
    %1 = arith.extui %0 : i1 to i32
    %c0_i32_0 = arith.constant 0 : i32
    %2 = arith.cmpi ne, %1, %c0_i32_0 : i32
    scf.if %2 {
      %cst_10 = arith.constant 0.000000e+00 : f32
      %22 = vector.broadcast %cst_10 : f32 to vector<16x32xf32>
      %c0_11 = arith.constant 0 : index
      %c0_12 = arith.constant 0 : index
      %23 = vector.load %arg7[%c0_11, %c0_12] : memref<16x32xf32, #tpu.memory_space<vmem>>, vector<16x32xf32>
      tpu.vector_store %arg7[%c0_11, %c0_12], %22 {strides = array<i32>} : memref<16x32xf32, #tpu.memory_space<vmem>>, vector<16x32xf32>,
    } else {
    }
    %c0 = arith.constant 0 : index
    %c0_1 = arith.constant 0 : index
    %3 = vector.load %arg3[%c0, %c0_1] : memref<16x1xi32, #tpu.memory_space<vmem>>, vector<16x1xi32>
    %4 = tpu.iota {dimensions = array<i32: 1>} : vector<16x16xi32>
    %c16_i32 = arith.constant 16 : i32
    %5 = arith.muli %arg1, %c16_i32 : i32
    %6 = vector.broadcast %5 : i32 to vector<16x16xi32>
    %7 = arith.addi %4, %6 : vector<16x16xi32>
    %8 = vector.broadcast %3 : vector<16x1xi32> to vector<16x16xi32>
    %9 = arith.cmpi eq, %8, %7 : vector<16x16xi32>
    %10 = arith.extui %9 : vector<16x16xi1> to vector<16x16xi32>
    %11 = arith.sitofp %10 : vector<16x16xi32> to vector<16x16xf32>
    %c0_2 = arith.constant 0 : index
    %c0_3 = arith.constant 0 : index
    %12 = vector.load %arg7[%c0_2, %c0_3] : memref<16x32xf32, #tpu.memory_space<vmem>>, vector<16x32xf32>
    %c0_4 = arith.constant 0 : index
    %c0_5 = arith.constant 0 : index
    %13 = vector.load %arg5[%c0_4, %c0_5] : memref<16x32xf32, #tpu.memory_space<vmem>>, vector<16x32xf32>
    %cst = arith.constant dense<0.000000e+00> : vector<16x32xf32>
    %14 = tpu.matmul %11, %13, %cst {dimension_numbers = #tpu.dot_dimension_numbers<[1], [0], [0], [1], [0, 0, 1, 1], [], []>} : vector<16x16xf32>, vector<16x32xf32>, vector<16x32xf32> -> vector<16x32xf32>
    %15 = arith.addf %12, %14 : vector<16x32xf32>
    %c0_i32_6 = arith.constant 0 : i32
    %16 = arith.cmpi slt, %arg1, %c0_i32_6 : i32
    %17 = arith.extui %16 : i1 to i32
    %c0_i32_7 = arith.constant 0 : i32
    %18 = arith.cmpi ne, %17, %c0_i32_7 : i32
    scf.if %18 {
      %c0_10 = arith.constant 0 : index
      %c0_11 = arith.constant 0 : index
      %22 = vector.load %arg7[%c0_10, %c0_11] : memref<16x32xf32, #tpu.memory_space<vmem>>, vector<16x32xf32>
      tpu.vector_store %arg7[%c0_10, %c0_11], %15 {strides = array<i32>} : memref<16x32xf32, #tpu.memory_space<vmem>>, vector<16x32xf32>,
    } else {
    }
    %c0_i32_8 = arith.constant 0 : i32
    %19 = arith.cmpi eq, %arg1, %c0_i32_8 : i32
    %20 = arith.extui %19 : i1 to i32
    %c0_i32_9 = arith.constant 0 : i32
    %21 = arith.cmpi ne, %20, %c0_i32_9 : i32
    scf.if %21 {
      %c0_10 = arith.constant 0 : index
      %c0_11 = arith.constant 0 : index
      %22 = vector.load %arg4[%c0_10, %c0_11] : memref<16x1xi32, #tpu.memory_space<vmem>>, vector<16x1xi32>
      %23 = tpu.iota {dimensions = array<i32: 1>} : vector<16x16xi32>
      %24 = vector.broadcast %22 : vector<16x1xi32> to vector<16x16xi32>
      %25 = arith.cmpi eq, %24, %23 : vector<16x16xi32>
      %26 = arith.extui %25 : vector<16x16xi1> to vector<16x16xi32>
      %27 = arith.sitofp %26 : vector<16x16xi32> to vector<16x16xf32>
      %c0_12 = arith.constant 0 : index
      %c0_13 = arith.constant 0 : index
      %28 = vector.load %arg6[%c0_12, %c0_13] : memref<16x32xf32, #tpu.memory_space<vmem>>, vector<16x32xf32>
      %cst_14 = arith.constant dense<0.000000e+00> : vector<16x32xf32>
      %29 = tpu.matmul %27, %28, %cst_14 {dimension_numbers = #tpu.dot_dimension_numbers<[1], [0], [0], [1], [0, 0, 1, 1], [], []>} : vector<16x16xf32>, vector<16x32xf32>, vector<16x32xf32> -> vector<16x32xf32>
      %30 = arith.addf %15, %29 : vector<16x32xf32>
      %c0_15 = arith.constant 0 : index
      %c0_16 = arith.constant 0 : index
      %31 = vector.load %arg7[%c0_15, %c0_16] : memref<16x32xf32, #tpu.memory_space<vmem>>, vector<16x32xf32>
      tpu.vector_store %arg7[%c0_15, %c0_16], %30 {strides = array<i32>} : memref<16x32xf32, #tpu.memory_space<vmem>>, vector<16x32xf32>,
    } else {
    }
    return
  }
  func.func @transform_0(%arg0: i32, %arg1: i32, %arg2: memref<1xi32, #tpu.memory_space<smem>>) -> (i32, i32) {
    %c0_i32 = arith.constant 0 : i32
    %c0_i32_0 = arith.constant 0 : i32
    return %arg0, %c0_i32 : i32, i32
  }
  func.func @transform_1(%arg0: i32, %arg1: i32, %arg2: memref<1xi32, #tpu.memory_space<smem>>) -> (i32, i32) {
    %c0_i32 = arith.constant 0 : i32
    %c0_i32_0 = arith.constant 0 : i32
    return %arg0, %c0_i32 : i32, i32
  }
  func.func @transform_2(%arg0: i32, %arg1: i32, %arg2: memref<1xi32, #tpu.memory_space<smem>>) -> (i32, i32) {
    %c0_i32 = arith.constant 0 : i32
    %c0_i32_0 = arith.constant 0 : i32
    return %arg1, %c0_i32 : i32, i32
  }
  func.func @transform_3(%arg0: i32, %arg1: i32, %arg2: memref<1xi32, #tpu.memory_space<smem>>) -> (i32, i32) {
    %c0_i32 = arith.constant 0 : i32
    %c0_i32_0 = arith.constant 0 : i32
    %c0_i32_1 = arith.constant 0 : i32
    return %c0_i32, %c0_i32_0 : i32, i32
  }
  func.func @transform_4(%arg0: i32, %arg1: i32, %arg2: memref<1xi32, #tpu.memory_space<smem>>) -> (i32, i32) {
    %c0_i32 = arith.constant 0 : i32
    %c0_i32_0 = arith.constant 0 : i32
    return %arg0, %c0_i32 : i32, i32
  }
}

</mosaic_0001>

<bundles_post_ra>
// kernel: tpu_custom_call.1
= control target key start
LH: loop header
LB: loop body
LE: loop exit
PB: predicated region body
PF: predicated region fallthrough
CT: control target
= control target key end

     0   :  { %v205_v2 = vmov 0   ;;  %s271_s0 = inlined_call_operand.<no memory space> [shape: s32[1], index: 0, kind: input, shape index: {}]   ;;  %s272_s1 = inlined_call_operand.vmem [shape: s32[16,1], index: 1, kind: input, shape index: {}]   ;;  %s273_s2 = inlined_call_operand.vmem [shape: s32[16,1], index: 2, kind: input, shape index: {}]   ;;  %s274_s3 = inlined_call_operand.vmem [shape: f32[16,32], index: 3, kind: input, shape index: {}]   ;;  %s275_s4 = inlined_call_operand.vmem [shape: f32[16,32], index: 4, kind: input, shape index: {}]   ;;  %s276_s5 = inlined_call_operand.hbm [shape: f32[16,32], index: 5, kind: output, shape index: {}]  }
   0x1   :  { %v28_v0 = vld [vmem:[%s272_s1 + $0x8] sm:$0xff]  ;;  %v27_v1 = vld [vmem:[%s272_s1] sm:$0xff]  ;;  %178 = vset.pattern.permute.xlu1 %v205_v2  ;;  %177 = vset.pattern.permute.xlu0 %v205_v2 }
   0x2   :  { %v49_v3 = vld [vmem:[%s274_s3 + $0x8] sm:$0xff] }
   0x3   :  { %11 = vsyncpa [#allocation5], 0  ;;  %38 = vperm.xlu0 %177, %v28_v0   ;;  %35 = vperm.xlu1 %178, %v27_v1   ;;  %v93_v4 = vld [vmem:[%s273_s2 + $0x8] sm:$0xff]  ;;  %v92_v5 = vld [vmem:[%s273_s2] sm:$0xff]  ;;  %vm24_vm0 = vcmask 261120   ;;  %v206_v6 = vmov 0.0   ;;  %v29_v10 = vlaneseq }
   0x4   :  { %168 = vmatpush.msra.mxu2 %v49_v3  ;;  %71 = vmatpush.msra.mxu0 %v49_v3  ;;  %25 = vst.msk [vmem:[#allocation4] sm:$0xff] %vm24_vm0, %v206_v6  ;;  %v48_v7 = vld [vmem:[%s274_s3] sm:$0xff]  ;;  %v107_v8 = vld [vmem:[%s275_s4 + $0x8] sm:$0xff]  ;;  %vm50_vm1 = vcmask 130048   ;;  %s207_s3 = smov [#allocation4]   ;;  %s148_s8 = sshll.u32 %s276_s5, 4  ;;  %s149_s8 = int_to_ptr.hbm [resolvable:$true] %s148_s8 }
   0x5   :  { %26 = vst.msk [vmem:[#allocation4 + $0x8] sm:$0xff] %vm24_vm0, %v206_v6  ;;  %128 = vmatpush.msra.mxu1 %v107_v8  ;;  %170 = vmatpush.msra.mxu3 %v107_v8  ;;  %v106_v9 = vld [vmem:[%s275_s4] sm:$0xff]  ;;  %v30_v11 = vand.u32 127, %v29_v10  ;;  %s146_s4 = sshll.u32 %s207_s3, 4  ;;  %s208_s9 = smov 128   ;;  %s147_s4 = int_to_ptr.vmem [resolvable:$true] %s146_s4 }
   0x6   :  { %169 = vmatpush.msra.mxu2 %v48_v7  ;;  %72 = vmatpush.msra.mxu0 %v48_v7  ;;  %s209_s10 = smov 8  }
   0x7   :  { %129 = vmatpush.msra.mxu1 %v106_v9  ;;  %171 = vmatpush.msra.mxu3 %v106_v9 }
   0xb   :  { %98 = vperm.xlu0 %177, %v93_v4   ;;  %95 = vperm.xlu1 %178, %v92_v5   ;;  %v46_v20 = vld [vmem:[#allocation4] sm:$0xff] }
   0xc   :  { %v47_v25 = vld [vmem:[#allocation4 + $0x8] sm:$0xff] }
  0x75   :  { %v39_v12 = vpop.permute.xlu0 %38  ;;  %v36_v13 = vpop.permute.xlu1 %35 }
  0x76   :  { %vm41_vm2 = vcmp.eq.s32.totalorder %v39_v12, %v30_v11  ;;  %vm40_vm3 = vcmp.eq.s32.totalorder %v36_v13, %v30_v11 }
  0x77   :  { %v161_v14 = vsel %vm41_vm2, 1.0, %v206_v6  ;;  %v160_v15 = vsel %vm40_vm3, 1.0, %v206_v6 }
  0x78   :  { %163 = vmatmul.msk.f32.vlgmr.msra.gmra.mxu2 %vm50_vm1, %v161_v14  ;;  %162 = vmatmul.msk.f32.vlgmr.msra.gmra.mxu0 %vm50_vm1, %v160_v15 }
  0x7d   :  { %v99_v16 = vpop.permute.xlu0 %98  ;;  %v96_v17 = vpop.permute.xlu1 %95 }
  0x7e   :  { %vm101_vm4 = vcmp.eq.s32.totalorder %v99_v16, %v30_v11  ;;  %vm100_vm5 = vcmp.eq.s32.totalorder %v96_v17, %v30_v11 }
  0x7f   :  { %v165_v18 = vsel %vm101_vm4, 1.0, %v206_v6  ;;  %v164_v19 = vsel %vm100_vm5, 1.0, %v206_v6 }
  0x80   :  { %166 = vmatmul.msk.f32.vlgmr.msra.gmra.mxu1 %vm50_vm1, %v164_v19  ;;  %167 = vmatmul.msk.f32.vlgmr.msra.gmra.mxu3 %vm50_vm1, %v165_v18 }
  0xf5   :  { %v74_v21 = vpop.f32.mrf.mxu0 }
  0xf6   :  { %v80_v22 = vadd.f32 %v74_v21, %v46_v20 }
  0xfb   :  { %v77_v26 = vpop.f32.mrf.mxu2 }
  0xfc   :  { %v81_v27 = vadd.f32 %v77_v26, %v47_v25 }
  0xfd   :  { %v131_v23 = vpop.f32.mrf.mxu1 }
  0xfe   :  { %v137_v24 = vadd.f32 %v131_v23, %v80_v22 }
 0x100   :  { %140 = vst.msk [vmem:[#allocation4] sm:$0xff] %vm24_vm0, %v137_v24 }
 0x103   :  { %v134_v28 = vpop.f32.mrf.mxu3 }
 0x104   :  { %v138_v29 = vadd.f32 %v134_v28, %v81_v27 }
 0x106   :  { %141 = vst.msk [vmem:[#allocation4 + $0x8] sm:$0xff] %vm24_vm0, %v138_v29 }
 0x107   :  { %154 = dma.vmem_to_hbm [thread:$0]  %s147_s4, 256, %s149_s8, [#allocation5], %s208_s9, %s208_s9, %s209_s10  }
 0x108   :  { %203 = dma.done.wait [#allocation5], 256  }
 0x109   :  { %204 = vsyncadd [#allocation5], 4294967040 }
 0x10a   :  { %159 = vsyncpa [#allocation5], 1 }

</bundles_post_ra>
